<compile_context>
chip_gen: v7x
topology: tpu7x:2x2x1
jax: 0.10.0
libtpu: 0.0.40
codegen_flags: <defaults>
</compile_context>

<pallas_src>
import math

import jax
import jax.numpy as jnp
from jax import lax
from jax.experimental import pallas as pl
from jax.experimental.pallas import tpu as pltpu


def concatm_kernel(x_ref, w_ref, o_ref):
    # x_ref: (TB, 3d)   w_ref: (d, 3d)   o_ref: (TB, d)
    # One MXU contraction over K = 3d, contracting against W's native last
    # axis (equivalent to x @ W.T) with an f32 accumulator.
    acc = lax.dot_general(
        x_ref[...],
        w_ref[...],
        dimension_numbers=(((1,), (1,)), ((), ())),
        preferred_element_type=jnp.float32,
    )
    o_ref[...] = jnp.tanh(acc).astype(o_ref.dtype)


def concatm_forward(m_q, m_t, m_i, W, *, block_b=512):
    """m_q, m_t, m_i: (B, d); W: (d, 3d).  Returns tanh(cat(...) @ W.T): (B, d)."""
    B, d = m_q.shape
    assert W.shape == (d, 3 * d)

    # Concatenate activations in the wrapper: (B, 3d).  Cheap, XLA-fused,
    # and lets the kernel issue a single K=3d MXU push.
    x = jnp.concatenate([m_q, m_t, m_i], axis=1)

    # Batch tile: single block if B is small, else a sublane-aligned tile so
    # the (8, 128) block constraint holds and partial last blocks are masked.
    if B <= block_b:
        tb = B
    else:
        tb = max(8, (block_b // 8) * 8)
    grid = (pl.cdiv(B, tb),)

    cost = pl.CostEstimate(
        flops=2 * B * (3 * d) * d,
        transcendentals=B * d,
        bytes_accessed=4 * (B * 3 * d + 3 * d * d + B * d),
    )

    return pl.pallas_call(
        concatm_kernel,
        out_shape=jax.ShapeDtypeStruct((B, d), jnp.float32),
        grid_spec=pltpu.PrefetchScalarGridSpec(
            num_scalar_prefetch=0,
            grid=grid,
            in_specs=[
                # Batch-tiled concatenated activations.
                pl.BlockSpec((tb, 3 * d), lambda i: (i, 0)),
                # Weight block is grid-invariant (stays resident in VMEM).
                pl.BlockSpec((d, 3 * d), lambda i: (0, 0)),
            ],
            out_specs=pl.BlockSpec((tb, d), lambda i: (i, 0)),
        ),
        compiler_params=pltpu.CompilerParams(
            dimension_semantics=("parallel",),
        ),
        cost_estimate=cost,
    )(x, W)


if __name__ == "__main__":
    # Small demo shapes; d = 128 keeps the feature axis lane-dense.
    B, d = 8, 128

    key = jax.random.PRNGKey(0)
    k_q, k_t, k_i, k_w = jax.random.split(key, 4)

    m_q = jax.random.normal(k_q, (B, d), dtype=jnp.float32)
    m_t = jax.random.normal(k_t, (B, d), dtype=jnp.float32)
    m_i = jax.random.normal(k_i, (B, d), dtype=jnp.float32)

    # Deterministic param init mirroring the PyTorch module:
    # W ~ Uniform(-stdv, stdv), stdv = 1 / sqrt(3 * d), shape (d, 3d).
    stdv = 1.0 / math.sqrt(3 * d)
    W = jax.random.uniform(k_w, (d, 3 * d), dtype=jnp.float32,
                           minval=-stdv, maxval=stdv)

    out = concatm_forward(m_q, m_t, m_i, W)
    out = jax.block_until_ready(out)

    # Pure-JAX reference (same math as the PyTorch forward), high precision.
    cat = jnp.concatenate([m_q, m_t, m_i], axis=1)
    ref = jnp.tanh(
        jnp.einsum("bk,dk->bd", cat, W, precision=jax.lax.Precision.HIGHEST)
    )
    assert out.shape == (B, d)
    assert jnp.allclose(out, ref, atol=1e-4, rtol=1e-4)

    print("KERNEL_OK")
</pallas_src>

<mosaic_0001>
module attributes {stable_mosaic.version = 11 : i64} {
  func.func @concatm_kernel(%arg0: i32, %arg1: memref<8x384xf32, #tpu.memory_space<vmem>>, %arg2: memref<128x384xf32, #tpu.memory_space<vmem>>, %arg3: memref<8x128xf32, #tpu.memory_space<vmem>>) attributes {dimension_semantics = [#tpu.dimension_semantics<parallel>], iteration_bounds = array<i64: 1>, scalar_prefetch = 0 : i64, scratch_operands = 0 : i64, tpu.core_type = #tpu.core_type<tc>, window_params = [{transform_indices = @transform_0, window_bounds = array<i64: 8, 384>}, {pipeline_mode = #tpu.pipeline_mode<synchronous>, transform_indices = @transform_1, window_bounds = array<i64: 128, 384>}, {transform_indices = @transform_2, window_bounds = array<i64: 8, 128>}]} {
    %c0 = arith.constant 0 : index
    %c0_0 = arith.constant 0 : index
    %0 = vector.load %arg1[%c0, %c0_0] : memref<8x384xf32, #tpu.memory_space<vmem>>, vector<8x384xf32>
    %c0_1 = arith.constant 0 : index
    %c0_2 = arith.constant 0 : index
    %1 = vector.load %arg2[%c0_1, %c0_2] : memref<128x384xf32, #tpu.memory_space<vmem>>, vector<128x384xf32>
    %cst = arith.constant dense<0.000000e+00> : vector<8x128xf32>
    %2 = tpu.matmul %0, %1, %cst {dimension_numbers = #tpu.dot_dimension_numbers<[1], [1], [0], [0], [0, 0, 1, 0], [], []>} : vector<8x384xf32>, vector<128x384xf32>, vector<8x128xf32> -> vector<8x128xf32>
    %3 = math.tanh %2 : vector<8x128xf32>
    %c0_3 = arith.constant 0 : index
    %c0_4 = arith.constant 0 : index
    %4 = vector.load %arg3[%c0_3, %c0_4] : memref<8x128xf32, #tpu.memory_space<vmem>>, vector<8x128xf32>
    tpu.vector_store %arg3[%c0_3, %c0_4], %3 {strides = array<i32>} : memref<8x128xf32, #tpu.memory_space<vmem>>, vector<8x128xf32>,
    return
  }
  func.func @transform_0(%arg0: i32) -> (i32, i32) {
    %c0_i32 = arith.constant 0 : i32
    %c0_i32_0 = arith.constant 0 : i32
    return %arg0, %c0_i32 : i32, i32
  }
  func.func @transform_1(%arg0: i32) -> (i32, i32) {
    %c0_i32 = arith.constant 0 : i32
    %c0_i32_0 = arith.constant 0 : i32
    %c0_i32_1 = arith.constant 0 : i32
    return %c0_i32, %c0_i32_0 : i32, i32
  }
  func.func @transform_2(%arg0: i32) -> (i32, i32) {
    %c0_i32 = arith.constant 0 : i32
    %c0_i32_0 = arith.constant 0 : i32
    return %arg0, %c0_i32 : i32, i32
  }
}

</mosaic_0001>

<bundles_post_ra>
// kernel: tpu_custom_call.1
= control target key start
LH: loop header
LB: loop body
LE: loop exit
PB: predicated region body
PF: predicated region fallthrough
CT: control target
= control target key end

     0   :  { %7 = vsyncpa [#allocation3], 0  ;;  %s512_s0 = inlined_call_operand.hbm [shape: f32[8,384], index: 0, kind: input, shape index: {}]   ;;  %s513_s1 = inlined_call_operand.hbm [shape: f32[128,384], index: 1, kind: input, shape index: {}]   ;;  %s514_s2 = inlined_call_operand.hbm [shape: f32[8,128], index: 2, kind: output, shape index: {}]  }
   0x1   :  { %8 = vsyncpa [#allocation6], 0 }
   0x2   :  { %9 = vsyncpa [#allocation4], 0  ;;  %s438_s9 = smov [#allocation2]   ;;  %s439_s11 = smov [#allocation5]  }
   0x3   :  { %s16_s10 = sshll.u32 %s438_s9, 4  ;;  %s25_s12 = sshll.u32 %s439_s11, 4  ;;  %s17_s10 = int_to_ptr.vmem [resolvable:$true] %s16_s10  ;;  %s461_s12 = int_to_ptr.vmem [resolvable:$true] %s25_s12 }
   0x4   :  { %s366_s15 = scalar_lea.hbm %s512_s0, 384 }
   0x5   :  { %p367_p0 = scmp.ne.s32.totalorder %s512_s0, %s366_s15  ;;  %p370_p1 = scmp.lt.u32.totalorder %s366_s15, %s512_s0 }
   0x7   :  { %p372_p2 = pnand %p370_p1, %p367_p0 }
   0x9   :  { %375 = shalt.err (!%p372_p2)
}
   0xa   :  { %s376_s20 = scalar_lea.vmem %s17_s10, 384  ;;  %p381_p4 = scmp.lt.s32.totalorder %s17_s10, %s17_s10 }
   0xb   :  { %p377_p3 = scmp.ne.s32.totalorder %s17_s10, %s376_s20  ;;  %p382_p5 = scmp.lt.s32.totalorder %s376_s20, %s376_s20 }
   0xd   :  { %p383_p6 = por %p382_p5, %p381_p4 }
   0xf   :  { %p384_p7 = pnand %p383_p6, %p377_p3 }
  0x11   :  { %387 = shalt.err (!%p384_p7)
}
  0x12   :  { %19 = dma.hbm_to_vmem [thread:$0]  %s512_s0, 384, %s17_s10, [#allocation3]  }
  0x13   :  { %s388_s25 = scalar_lea.hbm %s513_s1, 6144 }
  0x14   :  { %p389_p8 = scmp.ne.s32.totalorder %s513_s1, %s388_s25  ;;  %p392_p9 = scmp.lt.u32.totalorder %s388_s25, %s513_s1 }
  0x16   :  { %p394_p10 = pnand %p392_p9, %p389_p8 }
  0x18   :  { %397 = shalt.err (!%p394_p10)
}
  0x19   :  { %s398_s30 = scalar_lea.vmem %s461_s12, 6144  ;;  %p403_p12 = scmp.lt.s32.totalorder %s461_s12, %s461_s12 }
  0x1a   :  { %p399_p11 = scmp.ne.s32.totalorder %s461_s12, %s398_s30  ;;  %p404_p13 = scmp.lt.s32.totalorder %s398_s30, %s398_s30 }
  0x1c   :  { %p405_p0 = por %p404_p13, %p403_p12 }
  0x1e   :  { %p406_p1 = pnand %p405_p0, %p399_p11 }
  0x20   :  { %409 = shalt.err (!%p406_p1)
}
  0x21   :  { %s440_s0 = smov 384   ;;  %s441_s3 = smov 24  }
  0x22   :  { %31 = dma.hbm_to_vmem [thread:$0]  %s513_s1, 6144, %s461_s12, [#allocation6], %s440_s0, %s440_s0, %s441_s3  }
  0x23   :  { %432 = dma.done.wait [#allocation3], 384  }
  0x24   :  { %433 = vsyncadd [#allocation3], 4294966912 }
  0x25   :  { %434 = dma.done.wait [#allocation6], 6144  }
  0x26   :  { %435 = vsyncadd [#allocation6], 4294961152  ;;  %v442_v0 = vmov 0.0|0.0   ;;  %vm443_vm0 = vmmov 0   ;;  %v444_v1 = vmov 0.0   ;;  %v42_v2 = vld [vmem:[#allocation5 + $0x8] sm:$0xff] }
  0x27   :  { %331 = vmatprep.subr.bf16.mxu0 %v442_v0  ;;  %296 = vmatprep.mubr.msk.f32.mxu0 %vm443_vm0, %v444_v1  ;;  %v45_v3 = vld [vmem:[#allocation5 + $0x20] sm:$0xff]  ;;  %v43_v4 = vld [vmem:[#allocation5 + $0x10] sm:$0xff]  ;;  %v46_v6 = vld [vmem:[#allocation5 + $0x28] sm:$0xff]  ;;  %s445_s1 = smov [#allocation7]  }
  0x28   :  { %v299_v5 = vpack.c.bf16 %v45_v3, %v42_v2  ;;  %v41_v7 = vld [vmem:[#allocation5] sm:$0xff]  ;;  %v44_v8 = vld [vmem:[#allocation5 + $0x18] sm:$0xff]  ;;  %v332_v9 = vpack.c.bf16 %v46_v6, %v43_v4  ;;  %v51_v12 = vld [vmem:[#allocation5 + $0x50] sm:$0xff]  ;;  %s237_s6 = sshll.u32 %s445_s1, 4  ;;  %s238_s6 = int_to_ptr.vmem [resolvable:$true] %s237_s6 }
  0x29   :  { %v301_v10 = vpack.c.bf16 %v44_v8, %v41_v7  ;;  %v48_v11 = vld [vmem:[#allocation5 + $0x38] sm:$0xff]  ;;  %v49_v14 = vld [vmem:[#allocation5 + $0x40] sm:$0xff]  ;;  %v47_v16 = vld [vmem:[#allocation5 + $0x30] sm:$0xff]  ;;  %s410_s7 = scalar_lea.vmem %s238_s6, 128  ;;  %p415_p3 = scmp.lt.s32.totalorder %s238_s6, %s238_s6 }
  0x2a   :  { %300 = vmatprep.subr.bf16.mxu1 %v299_v5  ;;  %v303_v13 = vpack.c.bf16 %v51_v12, %v48_v11  ;;  %333 = vmatpush3.bf16.xpose.msra.mxu0 %v332_v9  ;;  %v52_v15 = vld [vmem:[#allocation5 + $0x58] sm:$0xff]  ;;  %v50_v17 = vld [vmem:[#allocation5 + $0x48] sm:$0xff]  ;;  %v57_v19 = vld [vmem:[#allocation5 + $0x80] sm:$0xff]  ;;  %p411_p2 = scmp.ne.s32.totalorder %s238_s6, %s410_s7  ;;  %p416_p4 = scmp.lt.s32.totalorder %s410_s7, %s410_s7 }
  0x2b   :  { %302 = vmatpush1.bf16.xpose.msra.mxu1 %v301_v10  ;;  %334 = vmatprep.subr.bf16.mxu0 %v442_v0  ;;  %v54_v18 = vld [vmem:[#allocation5 + $0x68] sm:$0xff]  ;;  %v335_v20 = vpack.c.bf16 %v52_v15, %v49_v14  ;;  %v305_v21 = vpack.c.bf16 %v50_v17, %v47_v16  ;;  %v55_v23 = vld [vmem:[#allocation5 + $0x70] sm:$0xff]  ;;  %v53_v25 = vld [vmem:[#allocation5 + $0x60] sm:$0xff] }
  0x2c   :  { %304 = vmatprep.subr.bf16.mxu1 %v303_v13  ;;  %v307_v22 = vpack.c.bf16 %v57_v19, %v54_v18  ;;  %v58_v24 = vld [vmem:[#allocation5 + $0x88] sm:$0xff]  ;;  %v56_v26 = vld [vmem:[#allocation5 + $0x78] sm:$0xff]  ;;  %v63_v28 = vld [vmem:[#allocation5 + $0xb0] sm:$0xff]  ;;  %p417_p5 = por %p416_p4, %p415_p3 }
  0x2d   :  { %v60_v27 = vld [vmem:[#allocation5 + $0x98] sm:$0xff]  ;;  %v338_v29 = vpack.c.bf16 %v58_v24, %v55_v23  ;;  %v309_v30 = vpack.c.bf16 %v56_v26, %v53_v25  ;;  %v39_v31 = vld [vmem:[#allocation2 + $0x8] sm:$0xff]  ;;  %v61_v33 = vld [vmem:[#allocation5 + $0xa0] sm:$0xff] }
  0x2e   :  { %v311_v32 = vpack.c.bf16 %v63_v28, %v60_v27  ;;  %153 = vmatprep.mubr.f32.mxu1 %v39_v31  ;;  %v64_v34 = vld [vmem:[#allocation5 + $0xb8] sm:$0xff]  ;;  %v59_v35 = vld [vmem:[#allocation5 + $0x90] sm:$0xff]  ;;  %v62_v36 = vld [vmem:[#allocation5 + $0xa8] sm:$0xff]  ;;  %p418_p6 = pnand %p417_p5, %p411_p2 }
  0x2f   :  { %v66_v37 = vld [vmem:[#allocation5 + $0xc8] sm:$0xff]  ;;  %v69_v38 = vld [vmem:[#allocation5 + $0xe0] sm:$0xff]  ;;  %v341_v39 = vpack.c.bf16 %v64_v34, %v61_v33  ;;  %v313_v40 = vpack.c.bf16 %v62_v36, %v59_v35  ;;  %v67_v42 = vld [vmem:[#allocation5 + $0xd0] sm:$0xff] }
  0x30   :  { %v315_v41 = vpack.c.bf16 %v69_v38, %v66_v37  ;;  %v70_v43 = vld [vmem:[#allocation5 + $0xe8] sm:$0xff]  ;;  %v65_v44 = vld [vmem:[#allocation5 + $0xc0] sm:$0xff]  ;;  %v68_v45 = vld [vmem:[#allocation5 + $0xd8] sm:$0xff] }
  0x31   :  { %v72_v46 = vld [vmem:[#allocation5 + $0xf8] sm:$0xff]  ;;  %v75_v47 = vld [vmem:[#allocation5 + $0x110] sm:$0xff]  ;;  %v344_v48 = vpack.c.bf16 %v70_v43, %v67_v42  ;;  %v317_v49 = vpack.c.bf16 %v68_v45, %v65_v44  ;;  %v73_v51 = vld [vmem:[#allocation5 + $0x100] sm:$0xff] }
  0x32   :  { %336 = vmatpush3.bf16.xpose.msra.mxu0 %v335_v20  ;;  %v319_v50 = vpack.c.bf16 %v75_v47, %v72_v46  ;;  %v76_v52 = vld [vmem:[#allocation5 + $0x118] sm:$0xff]  ;;  %v71_v53 = vld [vmem:[#allocation5 + $0xf0] sm:$0xff]  ;;  %v74_v54 = vld [vmem:[#allocation5 + $0x108] sm:$0xff] }
  0x33   :  { %306 = vmatpush1.bf16.xpose.msra.mxu1 %v305_v21  ;;  %337 = vmatprep.subr.bf16.mxu0 %v442_v0  ;;  %v78_v55 = vld [vmem:[#allocation5 + $0x128] sm:$0xff]  ;;  %v81_v56 = vld [vmem:[#allocation5 + $0x140] sm:$0xff]  ;;  %v347_v57 = vpack.c.bf16 %v76_v52, %v73_v51  ;;  %v321_v58 = vpack.c.bf16 %v74_v54, %v71_v53  ;;  %v79_v60 = vld [vmem:[#allocation5 + $0x130] sm:$0xff] }
  0x34   :  { %308 = vmatprep.subr.bf16.mxu1 %v307_v22  ;;  %v323_v59 = vpack.c.bf16 %v81_v56, %v78_v55  ;;  %v82_v61 = vld [vmem:[#allocation5 + $0x148] sm:$0xff]  ;;  %v77_v62 = vld [vmem:[#allocation5 + $0x120] sm:$0xff]  ;;  %v80_v63 = vld [vmem:[#allocation5 + $0x138] sm:$0xff] }
  0x35   :  { %v84_v1 = vld [vmem:[#allocation5 + $0x158] sm:$0xff]  ;;  %v87_v2 = vld [vmem:[#allocation5 + $0x170] sm:$0xff]  ;;  %v350_v3 = vpack.c.bf16 %v82_v61, %v79_v60  ;;  %v325_v4 = vpack.c.bf16 %v80_v63, %v77_v62  ;;  %v85_v6 = vld [vmem:[#allocation5 + $0x160] sm:$0xff] }
  0x36   :  { %v327_v5 = vpack.c.bf16 %v87_v2, %v84_v1  ;;  %v88_v7 = vld [vmem:[#allocation5 + $0x178] sm:$0xff]  ;;  %v83_v8 = vld [vmem:[#allocation5 + $0x150] sm:$0xff]  ;;  %v86_v9 = vld [vmem:[#allocation5 + $0x168] sm:$0xff] }
  0x37   :  { %v353_v10 = vpack.c.bf16 %v88_v7, %v85_v6  ;;  %v329_v11 = vpack.c.bf16 %v86_v9, %v83_v8  ;;  %v40_v12 = vld [vmem:[#allocation2 + $0x10] sm:$0xff]  ;;  %v38_v13 = vld [vmem:[#allocation2] sm:$0xff] }
  0x3a   :  { %339 = vmatpush3.bf16.xpose.msra.mxu0 %v338_v29 }
  0x3b   :  { %310 = vmatpush1.bf16.xpose.msra.mxu1 %v309_v30  ;;  %340 = vmatprep.subr.bf16.mxu0 %v442_v0 }
  0x3c   :  { %312 = vmatprep.subr.bf16.mxu1 %v311_v32 }
  0x42   :  { %342 = vmatpush3.bf16.xpose.msra.mxu0 %v341_v39 }
  0x43   :  { %314 = vmatpush1.bf16.xpose.msra.mxu1 %v313_v40  ;;  %343 = vmatprep.subr.bf16.mxu0 %v442_v0 }
  0x44   :  { %316 = vmatprep.subr.bf16.mxu1 %v315_v41 }
  0x4a   :  { %345 = vmatpush3.bf16.xpose.msra.mxu0 %v344_v48 }
  0x4b   :  { %318 = vmatpush1.bf16.xpose.msra.mxu1 %v317_v49  ;;  %346 = vmatprep.subr.bf16.mxu0 %v442_v0 }
  0x4c   :  { %320 = vmatprep.subr.bf16.mxu1 %v319_v50 }
  0x52   :  { %348 = vmatpush3.bf16.xpose.msra.mxu0 %v347_v57 }
  0x53   :  { %322 = vmatpush1.bf16.xpose.msra.mxu1 %v321_v58  ;;  %349 = vmatprep.subr.bf16.mxu0 %v442_v0 }
  0x54   :  { %324 = vmatprep.subr.bf16.mxu1 %v323_v59 }
  0x5a   :  { %351 = vmatpush3.bf16.xpose.msra.mxu0 %v350_v3 }
  0x5b   :  { %326 = vmatpush1.bf16.xpose.msra.mxu1 %v325_v4  ;;  %352 = vmatprep.subr.bf16.mxu0 %v442_v0 }
  0x5c   :  { %328 = vmatprep.subr.bf16.mxu1 %v327_v5 }
  0x62   :  { %354 = vmatpush3.bf16.xpose.msra.mxu0 %v353_v10 }
  0x63   :  { %330 = vmatpush1.bf16.xpose.msra.mxu1 %v329_v11 }
  0x69   :  { %297 = vmatmul.mubr.f32.vlgmr.msra.gmra.mrb[0].mxu0 %v40_v12 }
  0x6a   :  { %154 = vmatmul.mubr.f32.vlgmr.msra.gmra.mrb[0].mxu1 %v38_v13 }
 0x13c   :  { %v225_v14 = vpop.f32.mrb[0].mxu0 }
 0x13d   :  { %v155_v15 = vpop.f32.mrb[0].mxu1  ;;  %v298_v17 = vpop.f32.mrb[1].mxu0 }
 0x13e   :  { %v226_v16 = vadd.f32 %v225_v14, %v155_v15  ;;  %v157_v18 = vpop.f32.mrb[1].mxu1 }
 0x140   :  { %364 = vtanh.f32 %v226_v16 }
 0x14a   :  { %v365_v0 = vpop.eup %364 }
 0x14b   :  { %230 = vst [vmem:[#allocation7] sm:$0xff] %v365_v0 }
 0x14c   :  { %421 = shalt.err (!%p418_p6)
}
 0x14d   :  { %s422_s10 = scalar_lea.hbm %s514_s2, 128 }
 0x14e   :  { %p423_p7 = scmp.ne.s32.totalorder %s514_s2, %s422_s10  ;;  %p426_p8 = scmp.lt.u32.totalorder %s422_s10, %s514_s2 }
 0x150   :  { %p428_p9 = pnand %p426_p8, %p423_p7 }
 0x152   :  { %431 = shalt.err (!%p428_p9)
}
 0x153   :  { %240 = dma.vmem_to_hbm [thread:$0]  %s238_s6, 128, %s514_s2, [#allocation4]  }
 0x154   :  { %436 = dma.done.wait [#allocation4], 128  }
 0x155   :  { %437 = vsyncadd [#allocation4], 4294967168 }
 0x156   :  { %244 = vsyncpa [#allocation3], 1 }
 0x157   :  { %245 = vsyncpa [#allocation6], 1 }
 0x158   :  { %246 = vsyncpa [#allocation4], 1 }

</bundles_post_ra>
